<compile_context>
chip_gen: v5e
topology: v5e:2x2
jax: 0.10.0
libtpu: 0.0.40
codegen_flags: <defaults>
</compile_context>

<pallas_src>
import jax
import jax.numpy as jnp
from jax.experimental import pallas as pl
from jax.experimental.pallas import tpu as pltpu


def _gelu_kernel(x_ref, o_ref):
    # Exact GELU: x * 0.5 * (1 + erf(x / sqrt(2)))  (matches F.gelu default).
    x = x_ref[...].astype(jnp.float32)
    inv_sqrt2 = 0.7071067811865476
    y = x * (0.5 * (1.0 + jax.lax.erf(x * inv_sqrt2)))
    o_ref[...] = y.astype(o_ref.dtype)


def gelu_pallas(x, *, block_bytes=2 * 1024 * 1024):
    orig_shape = x.shape
    dtype = x.dtype
    n = x.size
    if n == 0:
        return x

    itemsize = jnp.dtype(dtype).itemsize
    # Minimum sublane granularity: 8 rows for 32-bit, 16 for 16-bit, 32 for 8-bit.
    sublane = max(8, 32 // itemsize)

    # Pick the widest lane-dense column width that divides n (free reshape, no copy).
    cols = None
    for c in (4096, 2048, 1024, 512, 256, 128):
        if n % c == 0:
            cols = c
            break

    flat = x.reshape(-1)
    padded = False
    if cols is None:
        # Rare path: pad the flat array up to a multiple of 128 (gelu(0) = 0, safe).
        cols = 128
        pad = (-n) % cols
        flat = jnp.pad(flat, (0, pad))
        padded = True

    rows = flat.size // cols
    x2d = flat.reshape(rows, cols)

    # Target ~block_bytes per block, rounded to a sublane multiple.
    target_rows = max(sublane, block_bytes // (cols * itemsize))
    target_rows = (target_rows // sublane) * sublane
    if rows <= target_rows:
        block_rows = rows          # whole array in one block (full-dim block is legal)
    else:
        block_rows = target_rows   # multiple of sublane; last partial block is masked

    grid = (pl.cdiv(rows, block_rows),)

    cost = pl.CostEstimate(
        flops=6 * n,
        transcendentals=n,
        bytes_accessed=2 * n * itemsize,
    )

    out2d = pl.pallas_call(
        _gelu_kernel,
        out_shape=jax.ShapeDtypeStruct((rows, cols), dtype),
        grid_spec=pltpu.PrefetchScalarGridSpec(
            num_scalar_prefetch=0,
            grid=grid,
            in_specs=[pl.BlockSpec((block_rows, cols), lambda i: (i, 0))],
            out_specs=pl.BlockSpec((block_rows, cols), lambda i: (i, 0)),
        ),
        compiler_params=pltpu.CompilerParams(
            dimension_semantics=("parallel",),
        ),
        cost_estimate=cost,
    )(x2d)

    if padded:
        return out2d.reshape(-1)[:n].reshape(orig_shape)
    return out2d.reshape(orig_shape)


if __name__ == "__main__":
    key = jax.random.PRNGKey(0)

    # Shape consistent with a typical NCHW activation: batch=2, channels=4, 16x16.
    x = jax.random.normal(key, (2, 4, 16, 16), dtype=jnp.float32)
    y = jax.block_until_ready(gelu_pallas(x))
    y_ref = jax.nn.gelu(x, approximate=False)
    assert y.shape == x.shape and y.dtype == x.dtype
    assert jnp.max(jnp.abs(y - y_ref)) < 1e-5

    # Also exercise the non-128-divisible (padding) path.
    x2 = jax.random.normal(jax.random.PRNGKey(1), (3, 5, 7), dtype=jnp.float32)
    y2 = jax.block_until_ready(gelu_pallas(x2))
    y2_ref = jax.nn.gelu(x2, approximate=False)
    assert y2.shape == x2.shape and y2.dtype == x2.dtype
    assert jnp.max(jnp.abs(y2 - y2_ref)) < 1e-5

    print("KERNEL_OK")
</pallas_src>

<mosaic_0001>
module attributes {stable_mosaic.version = 11 : i64} {
  func.func @_gelu_kernel(%arg0: i32, %arg1: memref<1x2048xf32, #tpu.memory_space<vmem>>, %arg2: memref<1x2048xf32, #tpu.memory_space<vmem>>) attributes {dimension_semantics = [#tpu.dimension_semantics<parallel>], iteration_bounds = array<i64: 1>, scalar_prefetch = 0 : i64, scratch_operands = 0 : i64, tpu.core_type = #tpu.core_type<tc>, window_params = [{transform_indices = @transform_0, window_bounds = array<i64: 1, 2048>}, {transform_indices = @transform_1, window_bounds = array<i64: 1, 2048>}]} {
    %c0 = arith.constant 0 : index
    %c0_0 = arith.constant 0 : index
    %0 = vector.load %arg1[%c0, %c0_0] : memref<1x2048xf32, #tpu.memory_space<vmem>>, vector<1x2048xf32>
    %cst = arith.constant 0.707106769 : f32
    %1 = vector.broadcast %cst : f32 to vector<1x2048xf32>
    %2 = arith.mulf %0, %1 : vector<1x2048xf32>
    %3 = math.erf %2 : vector<1x2048xf32>
    %cst_1 = arith.constant 1.000000e+00 : f32
    %4 = vector.broadcast %cst_1 : f32 to vector<1x2048xf32>
    %5 = arith.addf %4, %3 : vector<1x2048xf32>
    %cst_2 = arith.constant 5.000000e-01 : f32
    %6 = vector.broadcast %cst_2 : f32 to vector<1x2048xf32>
    %7 = arith.mulf %6, %5 : vector<1x2048xf32>
    %8 = arith.mulf %0, %7 : vector<1x2048xf32>
    %c0_3 = arith.constant 0 : index
    %c0_4 = arith.constant 0 : index
    %9 = vector.load %arg2[%c0_3, %c0_4] : memref<1x2048xf32, #tpu.memory_space<vmem>>, vector<1x2048xf32>
    tpu.vector_store %arg2[%c0_3, %c0_4], %8 {strides = array<i32>} : memref<1x2048xf32, #tpu.memory_space<vmem>>, vector<1x2048xf32>,
    return
  }
  func.func @transform_0(%arg0: i32) -> (i32, i32) {
    %c0_i32 = arith.constant 0 : i32
    %c0_i32_0 = arith.constant 0 : i32
    return %arg0, %c0_i32 : i32, i32
  }
  func.func @transform_1(%arg0: i32) -> (i32, i32) {
    %c0_i32 = arith.constant 0 : i32
    %c0_i32_0 = arith.constant 0 : i32
    return %arg0, %c0_i32 : i32, i32
  }
}

</mosaic_0001>

<bundles_post_ra>
// kernel: tpu_custom_call.1
= control target key start
LH: loop header
LB: loop body
LE: loop exit
PB: predicated region body
PF: predicated region fallthrough
CT: control target
= control target key end

     0   :  { %6 = vsyncpa [#allocation3], 0  ;;  %s228_s0 = inlined_call_operand.hbm [shape: f32[1,2048], index: 0, kind: input, shape index: {}]   ;;  %s229_s1 = inlined_call_operand.hbm [shape: f32[1,2048], index: 1, kind: output, shape index: {}]  }
   0x1   :  { %7 = vsyncpa [#allocation4], 0  ;;  %s13_s8 = sshll.u32 %s228_s0, 4  ;;  %s192_s9 = smov [#allocation2]   ;;  %s14_s8 = int_to_ptr.hbm [resolvable:$true] %s13_s8 }
   0x2   :  { %s15_s10 = sshll.u32 %s192_s9, 4  ;;  %s16_s10 = int_to_ptr.vmem [resolvable:$true] %s15_s10 }
   0x3   :  { %18 = dma.hbm_to_vmem [thread:$0]  %s14_s8, 256, %s16_s10, [#allocation3]  }
   0x4   :  { %188 = dma.done.wait [#allocation3], 256  }
   0x5   :  { %189 = vsyncadd [#allocation3], 4294967040  ;;  %v207_v0 = vld [vmem:[#allocation2] sm:$0xff]  ;;  %v209_v1 = vld [vmem:[#allocation2 + $0x8] sm:$0xff]  ;;  %s193_s0 = smov [#allocation5]   ;;  %s122_s14 = sshll.u32 %s229_s1, 4  ;;  %s123_s14 = int_to_ptr.hbm [resolvable:$true] %s122_s14 }
   0x6   :  { %v212_v2 = vmul.f32 0.70710677, %v207_v0  ;;  %v215_v3 = vmul.f32 0.70710677, %v209_v1  ;;  %s120_s11 = sshll.u32 %s193_s0, 4  ;;  %s121_s11 = int_to_ptr.vmem [resolvable:$true] %s120_s11 }
   0x8   :  { %v27_v4 = vmul.f32 %v212_v2, %v212_v2  ;;  %v67_v5 = vmul.f32 %v215_v3, %v215_v3 }
   0xa   :  { %v28_v6 = vmin.f32 %v27_v4, 16.0  ;;  %v68_v7 = vmin.f32 %v67_v5, 16.0 }
   0xc   :  { %v29_v8 = vmul.f32 2.1237322e-06, %v28_v6  ;;  %v40_v9 = vmul.f32 3.8918573e-05, %v28_v6  ;;  %v69_v10 = vmul.f32 2.1237322e-06, %v68_v7 }
   0xd   :  { %v80_v11 = vmul.f32 3.8918573e-05, %v68_v7 }
   0xe   :  { %v30_v12 = vadd.f32 0.00028619796, %v29_v8  ;;  %v41_v13 = vadd.f32 0.001143296, %v40_v9  ;;  %v70_v14 = vadd.f32 0.00028619796, %v69_v10 }
   0xf   :  { %v81_v15 = vadd.f32 0.001143296, %v80_v11 }
  0x10   :  { %v31_v16 = vmul.f32 %v30_v12, %v28_v6  ;;  %v42_v17 = vmul.f32 %v41_v13, %v28_v6  ;;  %v71_v18 = vmul.f32 %v70_v14, %v68_v7 }
  0x11   :  { %v82_v19 = vmul.f32 %v81_v15, %v68_v7 }
  0x12   :  { %v32_v20 = vadd.f32 0.0036580483, %v31_v16  ;;  %v43_v21 = vadd.f32 0.014752088, %v42_v17  ;;  %v72_v22 = vadd.f32 0.0036580483, %v71_v18 }
  0x13   :  { %v83_v23 = vadd.f32 0.014752088, %v82_v19 }
  0x14   :  { %v33_v24 = vmul.f32 %v32_v20, %v28_v6  ;;  %v44_v25 = vmul.f32 %v43_v21, %v28_v6  ;;  %v73_v26 = vmul.f32 %v72_v22, %v68_v7 }
  0x15   :  { %v84_v27 = vmul.f32 %v83_v23, %v68_v7 }
  0x16   :  { %v45_v28 = vadd.f32 0.112945676, %v44_v25  ;;  %v34_v29 = vadd.f32 0.05243302, %v33_v24  ;;  %v74_v32 = vadd.f32 0.05243302, %v73_v26 }
  0x17   :  { %v85_v30 = vadd.f32 0.112945676, %v84_v27 }
  0x18   :  { %v46_v31 = vmul.f32 %v45_v28, %v28_v6  ;;  %v35_v35 = vmul.f32 %v34_v29, %v28_v6  ;;  %v75_v38 = vmul.f32 %v74_v32, %v68_v7 }
  0x19   :  { %v86_v33 = vmul.f32 %v85_v30, %v68_v7 }
  0x1a   :  { %v47_v34 = vadd.f32 0.4994258, %v46_v31  ;;  %v36_v41 = vadd.f32 0.18741608, %v35_v35  ;;  %v76_v43 = vadd.f32 0.18741608, %v75_v38 }
  0x1b   :  { %v87_v36 = vadd.f32 0.4994258, %v86_v33 }
  0x1c   :  { %v48_v37 = vmul.f32 %v47_v34, %v28_v6  ;;  %v37_v44 = vmul.f32 %v36_v41, %v28_v6  ;;  %v77_v45 = vmul.f32 %v76_v43, %v68_v7 }
  0x1d   :  { %v88_v39 = vmul.f32 %v87_v36, %v68_v7 }
  0x1e   :  { %v49_v40 = vadd.f32 1.0, %v48_v37  ;;  %v38_v48 = vadd.f32 1.1283791, %v37_v44  ;;  %v78_v51 = vadd.f32 1.1283791, %v77_v45 }
  0x1f   :  { %v89_v42 = vadd.f32 1.0, %v88_v39 }
  0x20   :  { %136 = vrcp.f32 %v49_v40  ;;  %vm55_vm0 = vweird.f32 %v49_v40  ;;  %v61_v50 = vand.u32 2147483648, %v49_v40  ;;  %v59_v54 = vand.u32 2147483647, %v49_v40 }
  0x21   :  { %138 = vrcp.f32 %v89_v42  ;;  %v101_v55 = vand.u32 2147483648, %v89_v42  ;;  %vm95_vm2 = vweird.f32 %v89_v42  ;;  %v99_v57 = vand.u32 2147483647, %v89_v42 }
  0x22   :  { %v62_v59 = vor.u32 1.1754944e-38, %v61_v50  ;;  %v39_v61 = vmul.f32 %v38_v48, %v212_v2  ;;  %vm60_vm5 = vcmp.eq.f32.partialorder %v59_v54, 8.507059e+37  ;;  %v79_v4 = vmul.f32 %v78_v51, %v215_v3 }
  0x23   :  { %v102_v63 = vor.u32 1.1754944e-38, %v101_v55  ;;  %vm100_vm7 = vcmp.eq.f32.partialorder %v99_v57, 8.507059e+37 }
  0x26   :  { %v137_v46 = vpop.eup %136 }
  0x27   :  { %v139_v47 = vpop.eup %138  ;;  %v51_v49 = vmul.f32 %v137_v46, %v49_v40  ;;  %vm56_vm1 = vweird.f32 %v137_v46 }
  0x28   :  { %v91_v52 = vmul.f32 %v139_v47, %v89_v42  ;;  %vm96_vm3 = vweird.f32 %v139_v47  ;;  %vm57_vm4 = vmor %vm55_vm0, %vm56_vm1 }
  0x29   :  { %v52_v53 = vsub.f32 1.0, %v51_v49  ;;  %vm97_vm6 = vmor %vm95_vm2, %vm96_vm3 }
  0x2a   :  { %v92_v56 = vsub.f32 1.0, %v91_v52 }
  0x2b   :  { %v53_v58 = vmul.f32 %v137_v46, %v52_v53 }
  0x2c   :  { %v93_v60 = vmul.f32 %v139_v47, %v92_v56 }
  0x2d   :  { %v54_v62 = vadd.f32 %v137_v46, %v53_v58 }
  0x2e   :  { %v94_v5 = vadd.f32 %v139_v47, %v93_v60 }
  0x2f   :  { %v58_v6 = vsel %vm57_vm4, %v137_v46, %v54_v62 }
  0x30   :  { %v63_v7 = vsel %vm60_vm5, %v62_v59, %v58_v6  ;;  %v98_v8 = vsel %vm97_vm6, %v139_v47, %v94_v5 }
  0x31   :  { %v64_v9 = vmul.f32 %v63_v7, %v39_v61  ;;  %v103_v10 = vsel %vm100_vm7, %v102_v63, %v98_v8 }
  0x32   :  { %v104_v11 = vmul.f32 %v103_v10, %v79_v4 }
  0x33   :  { %v132_v12 = vclamps-f32 %v64_v9, 1.0 }
  0x34   :  { %v133_v13 = vclamps-f32 %v104_v11, 1.0 }
  0x35   :  { %v107_v14 = vadd.f32 1.0, %v132_v12 }
  0x36   :  { %v108_v15 = vadd.f32 1.0, %v133_v13 }
  0x37   :  { %v109_v16 = vmul.f32 0.5, %v107_v14 }
  0x38   :  { %v110_v2 = vmul.f32 0.5, %v108_v15 }
  0x39   :  { %v111_v3 = vmul.f32 %v109_v16, %v207_v0 }
  0x3a   :  { %v112_v17 = vmul.f32 %v110_v2, %v209_v1 }
  0x3b   :  { %113 = vst [vmem:[#allocation5] sm:$0xff] %v111_v3 }
  0x3c   :  { %114 = vst [vmem:[#allocation5 + $0x8] sm:$0xff] %v112_v17 }
  0x3d   :  { %125 = dma.vmem_to_hbm [thread:$0]  %s121_s11, 256, %s123_s14, [#allocation4]  }
  0x3e   :  { %190 = dma.done.wait [#allocation4], 256  }
  0x3f   :  { %191 = vsyncadd [#allocation4], 4294967040 }
  0x40   :  { %130 = vsyncpa [#allocation3], 1 }
  0x41   :  { %131 = vsyncpa [#allocation4], 1 }

</bundles_post_ra>
